<compile_context>
chip_gen: v6e
topology: v6e:2x2x1
jax: 0.10.0
libtpu: 0.0.40
codegen_flags: <defaults>
</compile_context>

<pallas_src>
import functools
import math

import jax
import jax.numpy as jnp
from jax import lax
from jax.experimental import pallas as pl
from jax.experimental.pallas import tpu as pltpu


def _round_up(x: int, m: int) -> int:
    return (x + m - 1) // m * m


def _ntxent_lse_kernel(q_ref, k_ref, self_ref, lse_ref, m_ref, l_ref, *,
                       tk: int, n_pad: int, resident_k: bool):
    """One (TQ, TK) tile of the 2N x 2N logit matrix with online LSE.

    q_ref:    (TQ, D)      bf16, rows pre-scaled by 1/temperature
    k_ref:    (padded, D)  bf16 (resident) or (TK, D) (streaming)
    self_ref: (TQ, 1)      f32 exact per-row self-logit (q_row . k_row)
    lse_ref:  (TQ, 1)      f32 output: per-row logsumexp over off-diag cols
    m_ref/l_ref: (TQ, 1)   f32 running max / running sum scratch
    """
    j = pl.program_id(1)                # col-block index (reduction, last axis)
    last_j = pl.num_programs(1) - 1

    @pl.when(j == 0)
    def _init():
        m_ref[...] = jnp.full_like(m_ref, -jnp.inf)
        l_ref[...] = jnp.zeros_like(l_ref)

    if resident_k:
        start = pl.multiple_of(j * tk, tk)
        k = k_ref[pl.ds(start, tk), :]
    else:
        k = k_ref[...]

    # (TQ, TK) logits tile: bf16 operands, f32 accumulation, contraction on D
    # in NT form (no transpose, no in-kernel temperature scaling).
    s = lax.dot_general(
        q_ref[...], k,
        dimension_numbers=(((1,), (1,)), ((), ())),
        preferred_element_type=jnp.float32,
    )

    # Online log-sum-exp update (f32; exp on the EUP).  No separate `p` tensor.
    m_prev = m_ref[...]                                          # (TQ, 1)
    m_new = jnp.maximum(m_prev, jnp.max(s, axis=-1, keepdims=True))
    l_ref[...] = (jnp.exp(m_prev - m_new) * l_ref[...]
                  + jnp.sum(jnp.exp(s - m_new), axis=-1, keepdims=True))
    m_ref[...] = m_new

    @pl.when(j == last_j)
    def _finalize():
        m = m_ref[...]
        # Remove the self-similarity term analytically (exact: self_ref is the
        # per-row dot of the same bf16 operands the MXU consumed).
        l = l_ref[...] - jnp.exp(self_ref[...] - m)
        if n_pad:
            # Padded K columns are exact zero vectors -> logit == 0 exactly,
            # so their total contribution is n_pad * exp(-m).  Branch-free.
            l = l - jnp.float32(n_pad) * jnp.exp(-m)
        lse_ref[...] = m + jnp.log(l)


def ntxent_loss(z1: jax.Array, z2: jax.Array, temperature: float = 0.5,
                block_q: int = 256, block_k: int = 256) -> jax.Array:
    """NT-Xent loss matching the PyTorch NTXentLoss.forward.  Returns f32 scalar."""
    n, d = z1.shape
    two_n = 2 * n
    inv_temp = 1.0 / float(temperature)

    # ---- O(2N*D) prologue in XLA (fuses into one pass): normalize with rsqrt,
    # ---- fold 1/T into the Q operand, cast to bf16 for the MXU, and compute
    # ---- the per-row self- and positive-logits FROM THE bf16 OPERANDS so they
    # ---- match the MXU numerics.
    z = jnp.concatenate([z1, z2], axis=0).astype(jnp.float32)    # (2N, D)
    ssq = jnp.sum(z * z, axis=-1, keepdims=True)
    zn = z * lax.rsqrt(jnp.maximum(ssq, 1e-16))                  # == z / max(|z|, 1e-8)
    q_b = (zn * inv_temp).astype(jnp.bfloat16)                   # rows (pre-scaled)
    k_b = zn.astype(jnp.bfloat16)                                # cols
    q32 = q_b.astype(jnp.float32)
    k32 = k_b.astype(jnp.float32)
    self_logit = jnp.sum(q32 * k32, axis=-1, keepdims=True)      # (2N, 1)
    pos = jnp.concatenate([
        jnp.sum(q32[:n] * k32[n:], axis=-1),                     # row i      -> col i+N
        jnp.sum(q32[n:] * k32[:n], axis=-1),                     # row i+N    -> col i
    ])                                                           # (2N,)

    # ---- tiling: decoupled row/col tiles, multiples of 16 (bf16 sublanes)
    tq = _round_up(min(block_q, _round_up(two_n, 16)), 16)
    tk = _round_up(min(block_k, _round_up(two_n, 16)), 16)
    pad_to = tq * tk // math.gcd(tq, tk)
    padded = _round_up(two_n, pad_to)
    n_pad = padded - two_n
    if n_pad:
        q_b = jnp.pad(q_b, ((0, n_pad), (0, 0)))
        k_b = jnp.pad(k_b, ((0, n_pad), (0, 0)))
        self_logit = jnp.pad(self_logit, ((0, n_pad), (0, 0)))
    gq = padded // tq
    gk = padded // tk

    # ---- resident-K decision: keep the whole key matrix in VMEM if it fits a
    # ---- conservative 24 MiB budget (counting possible double buffering),
    # ---- which is safe on v7x's 64 MiB physical VMEM as well.
    k_bytes = 2 * padded * d * 2                                  # 2 bufs * bf16
    resident_k = k_bytes <= (24 << 20)
    if resident_k:
        k_spec = pl.BlockSpec((padded, d), lambda i, j: (0, 0))
    else:
        k_spec = pl.BlockSpec((tk, d), lambda i, j: (j, 0))

    # Explicit scoped-VMEM limit sized from the actual footprint (inputs are
    # double-buffered; a few (tq, tk) f32 intermediates; 2 MiB headroom).
    vmem_need = ((k_bytes if resident_k else 2 * tk * d * 2)
                 + 2 * tq * d * 2          # q blocks
                 + 2 * tq * 4              # self_logit blocks
                 + 2 * tq * 4              # output blocks
                 + 2 * tq * 4              # m/l scratch
                 + 4 * tq * tk * 4         # s / exp intermediates
                 + (2 << 20))
    vmem_limit = int(min(max(vmem_need, 8 << 20), 48 << 20))

    cost = pl.CostEstimate(
        flops=2 * padded * padded * d,
        transcendentals=padded * padded,
        bytes_accessed=(padded * d * 2) * (2 if resident_k else (gq + 1))
                       + 2 * padded * 4,
    )

    kernel = functools.partial(_ntxent_lse_kernel, tk=tk, n_pad=n_pad,
                               resident_k=resident_k)

    lse = pl.pallas_call(
        kernel,
        out_shape=jax.ShapeDtypeStruct((padded, 1), jnp.float32),
        grid_spec=pltpu.PrefetchScalarGridSpec(
            num_scalar_prefetch=0,
            grid=(gq, gk),
            in_specs=[
                pl.BlockSpec((tq, d), lambda i, j: (i, 0)),   # row block (pre-scaled)
                k_spec,                                        # resident or streamed K
                pl.BlockSpec((tq, 1), lambda i, j: (i, 0)),   # exact self logits
            ],
            out_specs=pl.BlockSpec((tq, 1), lambda i, j: (i, 0)),
            scratch_shapes=[
                pltpu.VMEM((tq, 1), jnp.float32),   # running max m
                pltpu.VMEM((tq, 1), jnp.float32),   # running sum l
            ],
        ),
        compiler_params=pltpu.CompilerParams(
            dimension_semantics=("parallel", "arbitrary"),
            vmem_limit_bytes=vmem_limit,
        ),
        cost_estimate=cost,
    )(q_b, k_b, self_logit)

    # ---- XLA epilogue: drop padded rows, subtract positive logit, mean.
    lse = lse[:two_n, 0]
    return jnp.mean(lse - pos)


def _ntxent_ref(z1, z2, temperature=0.5):
    """Pure-JAX f32 reference mirroring the PyTorch module."""
    z = jnp.concatenate([z1, z2], axis=0).astype(jnp.float32)
    n = z1.shape[0]
    norm = jnp.maximum(jnp.linalg.norm(z, axis=-1, keepdims=True), 1e-8)
    zn = z / norm
    sim = (zn @ zn.T) / temperature
    two_n = 2 * n
    eye = jnp.eye(two_n, dtype=bool)
    sim = jnp.where(eye, -9e15, sim)
    labels = jnp.concatenate([jnp.arange(n) + n, jnp.arange(n)])
    logp = sim - jax.scipy.special.logsumexp(sim, axis=-1, keepdims=True)
    return -jnp.mean(logp[jnp.arange(two_n), labels])


if __name__ == "__main__":
    key = jax.random.PRNGKey(0)
    k1, k2, k3, k4 = jax.random.split(key, 4)

    # Test 1: tiny shape (single-tile path, no padding, resident K).
    N, D = 8, 32
    z1 = jax.random.normal(k1, (N, D), dtype=jnp.float32)
    z2 = jax.random.normal(k2, (N, D), dtype=jnp.float32)
    loss = jax.jit(ntxent_loss)(z1, z2)
    jax.block_until_ready(loss)
    ref = _ntxent_ref(z1, z2)
    assert jnp.allclose(loss, ref, atol=2e-2, rtol=2e-2), (loss, ref)

    # Test 2: multi-tile grid, decoupled tq != tk, in-kernel resident-K slicing
    # and row/col padding (2N = 140 padded to 192 with tq=64, tk=32).
    N2, D2 = 70, 48
    z1b = jax.random.normal(k3, (N2, D2), dtype=jnp.float32)
    z2b = jax.random.normal(k4, (N2, D2), dtype=jnp.float32)
    loss2 = jax.jit(
        lambda a, b: ntxent_loss(a, b, temperature=0.5, block_q=64, block_k=32)
    )(z1b, z2b)
    jax.block_until_ready(loss2)
    ref2 = _ntxent_ref(z1b, z2b)
    assert jnp.allclose(loss2, ref2, atol=2e-2, rtol=2e-2), (loss2, ref2)

    print("KERNEL_OK")
</pallas_src>

<mosaic_0001>
module attributes {stable_mosaic.version = 11 : i64} {
  func.func @_ntxent_lse_kernel(%arg0: i32, %arg1: i32, %arg2: memref<16x32xbf16, #tpu.memory_space<vmem>>, %arg3: memref<16x32xbf16, #tpu.memory_space<vmem>>, %arg4: memref<16x1xf32, #tpu.memory_space<vmem>>, %arg5: memref<16x1xf32, #tpu.memory_space<vmem>>, %arg6: memref<16x1xf32, #tpu.memory_space<vmem>>, %arg7: memref<16x1xf32, #tpu.memory_space<vmem>>) attributes {dimension_semantics = [#tpu.dimension_semantics<parallel>, #tpu.dimension_semantics<arbitrary>], iteration_bounds = array<i64: 1, 1>, scalar_prefetch = 0 : i64, scratch_operands = 2 : i64, tpu.core_type = #tpu.core_type<tc>, window_params = [{transform_indices = @transform_0, window_bounds = array<i64: 16, 32>}, {pipeline_mode = #tpu.pipeline_mode<synchronous>, transform_indices = @transform_1, window_bounds = array<i64: 16, 32>}, {transform_indices = @transform_2, window_bounds = array<i64: 16, 1>}, {transform_indices = @transform_3, window_bounds = array<i64: 16, 1>}]} {
    %c0_i32 = arith.constant 0 : i32
    %0 = arith.cmpi eq, %arg1, %c0_i32 : i32
    %1 = arith.extui %0 : i1 to i32
    %c0_i32_0 = arith.constant 0 : i32
    %2 = arith.cmpi ne, %1, %c0_i32_0 : i32
    scf.if %2 {
      %cst_15 = arith.constant 0xFF800000 : f32
      %28 = vector.broadcast %cst_15 : f32 to vector<16x1xf32>
      %c0_16 = arith.constant 0 : index
      %c0_17 = arith.constant 0 : index
      %29 = vector.load %arg6[%c0_16, %c0_17] : memref<16x1xf32, #tpu.memory_space<vmem>>, vector<16x1xf32>
      tpu.vector_store %arg6[%c0_16, %c0_17], %28 {strides = array<i32>} : memref<16x1xf32, #tpu.memory_space<vmem>>, vector<16x1xf32>,
      %cst_18 = arith.constant 0.000000e+00 : f32
      %30 = vector.broadcast %cst_18 : f32 to vector<16x1xf32>
      %c0_19 = arith.constant 0 : index
      %c0_20 = arith.constant 0 : index
      %31 = vector.load %arg7[%c0_19, %c0_20] : memref<16x1xf32, #tpu.memory_space<vmem>>, vector<16x1xf32>
      tpu.vector_store %arg7[%c0_19, %c0_20], %30 {strides = array<i32>} : memref<16x1xf32, #tpu.memory_space<vmem>>, vector<16x1xf32>,
    } else {
    }
    %c16_i32 = arith.constant 16 : i32
    %3 = arith.muli %arg1, %c16_i32 : i32
    %4 = tpu.assume_multiple %3, 16 : i32
    %5 = arith.index_cast %4 : i32 to index
    %c0 = arith.constant 0 : index
    %6 = vector.load %arg3[%5, %c0] : memref<16x32xbf16, #tpu.memory_space<vmem>>, vector<16x32xbf16>
    %c0_1 = arith.constant 0 : index
    %c0_2 = arith.constant 0 : index
    %7 = vector.load %arg2[%c0_1, %c0_2] : memref<16x32xbf16, #tpu.memory_space<vmem>>, vector<16x32xbf16>
    %cst = arith.constant dense<0.000000e+00> : vector<16x16xf32>
    %8 = tpu.matmul %7, %6, %cst {dimension_numbers = #tpu.dot_dimension_numbers<[1], [1], [0], [0], [0, 0, 1, 0], [], []>} : vector<16x32xbf16>, vector<16x32xbf16>, vector<16x16xf32> -> vector<16x16xf32>
    %c0_3 = arith.constant 0 : index
    %c0_4 = arith.constant 0 : index
    %9 = vector.load %arg6[%c0_3, %c0_4] : memref<16x1xf32, #tpu.memory_space<vmem>>, vector<16x1xf32>
    %cst_5 = arith.constant dense<0xFF800000> : vector<16xf32>
    %10 = vector.multi_reduction <maximumf>, %8, %cst_5 [1] : vector<16x16xf32> to vector<16xf32>
    %11 = vector.shape_cast %10 : vector<16xf32> to vector<16x1xf32>
    %12 = arith.maximumf %9, %11 : vector<16x1xf32>
    %13 = arith.subf %9, %12 : vector<16x1xf32>
    %14 = math.exp %13 : vector<16x1xf32>
    %c0_6 = arith.constant 0 : index
    %c0_7 = arith.constant 0 : index
    %15 = vector.load %arg7[%c0_6, %c0_7] : memref<16x1xf32, #tpu.memory_space<vmem>>, vector<16x1xf32>
    %16 = arith.mulf %14, %15 : vector<16x1xf32>
    %17 = vector.broadcast %12 : vector<16x1xf32> to vector<16x16xf32>
    %18 = arith.subf %8, %17 : vector<16x16xf32>
    %19 = math.exp %18 : vector<16x16xf32>
    %cst_8 = arith.constant dense<0.000000e+00> : vector<16xf32>
    %20 = vector.multi_reduction <add>, %19, %cst_8 [1] : vector<16x16xf32> to vector<16xf32>
    %21 = vector.shape_cast %20 : vector<16xf32> to vector<16x1xf32>
    %22 = arith.addf %16, %21 : vector<16x1xf32>
    %c0_9 = arith.constant 0 : index
    %c0_10 = arith.constant 0 : index
    %23 = vector.load %arg7[%c0_9, %c0_10] : memref<16x1xf32, #tpu.memory_space<vmem>>, vector<16x1xf32>
    tpu.vector_store %arg7[%c0_9, %c0_10], %22 {strides = array<i32>} : memref<16x1xf32, #tpu.memory_space<vmem>>, vector<16x1xf32>,
    %c0_11 = arith.constant 0 : index
    %c0_12 = arith.constant 0 : index
    %24 = vector.load %arg6[%c0_11, %c0_12] : memref<16x1xf32, #tpu.memory_space<vmem>>, vector<16x1xf32>
    tpu.vector_store %arg6[%c0_11, %c0_12], %12 {strides = array<i32>} : memref<16x1xf32, #tpu.memory_space<vmem>>, vector<16x1xf32>,
    %c0_i32_13 = arith.constant 0 : i32
    %25 = arith.cmpi eq, %arg1, %c0_i32_13 : i32
    %26 = arith.extui %25 : i1 to i32
    %c0_i32_14 = arith.constant 0 : i32
    %27 = arith.cmpi ne, %26, %c0_i32_14 : i32
    scf.if %27 {
      %c0_15 = arith.constant 0 : index
      %c0_16 = arith.constant 0 : index
      %28 = vector.load %arg6[%c0_15, %c0_16] : memref<16x1xf32, #tpu.memory_space<vmem>>, vector<16x1xf32>
      %c0_17 = arith.constant 0 : index
      %c0_18 = arith.constant 0 : index
      %29 = vector.load %arg7[%c0_17, %c0_18] : memref<16x1xf32, #tpu.memory_space<vmem>>, vector<16x1xf32>
      %c0_19 = arith.constant 0 : index
      %c0_20 = arith.constant 0 : index
      %30 = vector.load %arg4[%c0_19, %c0_20] : memref<16x1xf32, #tpu.memory_space<vmem>>, vector<16x1xf32>
      %31 = arith.subf %30, %28 : vector<16x1xf32>
      %32 = math.exp %31 : vector<16x1xf32>
      %33 = arith.subf %29, %32 : vector<16x1xf32>
      %34 = math.log %33 : vector<16x1xf32>
      %35 = arith.addf %28, %34 : vector<16x1xf32>
      %c0_21 = arith.constant 0 : index
      %c0_22 = arith.constant 0 : index
      %36 = vector.load %arg5[%c0_21, %c0_22] : memref<16x1xf32, #tpu.memory_space<vmem>>, vector<16x1xf32>
      tpu.vector_store %arg5[%c0_21, %c0_22], %35 {strides = array<i32>} : memref<16x1xf32, #tpu.memory_space<vmem>>, vector<16x1xf32>,
    } else {
    }
    return
  }
  func.func @transform_0(%arg0: i32, %arg1: i32) -> (i32, i32) {
    %c0_i32 = arith.constant 0 : i32
    %c0_i32_0 = arith.constant 0 : i32
    return %arg0, %c0_i32 : i32, i32
  }
  func.func @transform_1(%arg0: i32, %arg1: i32) -> (i32, i32) {
    %c0_i32 = arith.constant 0 : i32
    %c0_i32_0 = arith.constant 0 : i32
    %c0_i32_1 = arith.constant 0 : i32
    return %c0_i32, %c0_i32_0 : i32, i32
  }
  func.func @transform_2(%arg0: i32, %arg1: i32) -> (i32, i32) {
    %c0_i32 = arith.constant 0 : i32
    %c0_i32_0 = arith.constant 0 : i32
    return %arg0, %c0_i32 : i32, i32
  }
  func.func @transform_3(%arg0: i32, %arg1: i32) -> (i32, i32) {
    %c0_i32 = arith.constant 0 : i32
    %c0_i32_0 = arith.constant 0 : i32
    return %arg0, %c0_i32 : i32, i32
  }
}

</mosaic_0001>

<bundles_post_ra>
// kernel: ntxent_loss.1
= control target key start
LH: loop header
LB: loop body
LE: loop exit
PB: predicated region body
PF: predicated region fallthrough
CT: control target
= control target key end

     0   :  { %vm19_vm0 = vcmask 7168   ;;  %vm43_vm1 = vcmask 261120   ;;  %v207_v0 = vmov 0.0   ;;  %vm208_vm2 = vmmov 0   ;;  %s263_s1 = inlined_call_operand.vmem [shape: bf16[16,32], index: 1, kind: input, shape index: {}]   ;;  %s264_s0 = inlined_call_operand.vmem [shape: bf16[16,32], index: 0, kind: input, shape index: {}]   ;;  %s265_s2 = inlined_call_operand.vmem [shape: f32[16,1], index: 2, kind: input, shape index: {}]   ;;  %s266_s3 = inlined_call_operand.vmem [shape: f32[16,1], index: 3, kind: output, shape index: {}]  }
   0x1   :  { %22 = vst.msk [vmem:[#allocation3] sm:$0xff] %vm19_vm0, %v207_v0  ;;  %23 = vst.msk [vmem:[#allocation3 + $0x8] sm:$0xff] %vm19_vm0, %v207_v0  ;;  %177 = vmatprep.subr.bf16.mxu0 %v207_v0  ;;  %v189_v1 = vld [vmem:[%s263_s1] sm:$0xff]   ;;  %179 = vmatprep.mubr.msk.bf16.mxu0 %vm208_vm2, %v207_v0  ;;  %v209_v4 = vmov -inf   ;;  %vm93_vm3 = vcmask 130048   ;;  %v210_v11 = vmov 0  }
   0x2   :  { %v48_v2 = vsel %vm43_vm1, %v189_v1, 0  ;;  %v190_v3 = vld [vmem:[%s264_s0] sm:$0xff]   ;;  %20 = vst.msk [vmem:[#allocation2] sm:$0xff] %vm19_vm0, %v209_v4  ;;  %21 = vst.msk [vmem:[#allocation2 + $0x8] sm:$0xff] %vm19_vm0, %v209_v4  ;;  %187 = vset.pattern.permute.xlu1 %v210_v11  ;;  %188 = vset.pattern.permute.xlu0 %v210_v11  ;;  %v149_v35 = vld [vmem:[%s265_s2 + $0x8] sm:$0xff] }
   0x3   :  { %178 = vmatpush3.bf16.xpose.msra.mxu0 %v48_v2  ;;  %v148_v32 = vld [vmem:[%s265_s2] sm:$0xff] }
   0x8   :  { %v108_v40 = vld [vmem:[#allocation3] sm:$0xff]  ;;  %v109_v45 = vld [vmem:[#allocation3 + $0x8] sm:$0xff] }
   0x9   :  { %v91_v12 = vld [vmem:[#allocation2] sm:$0xff]  ;;  %v92_v15 = vld [vmem:[#allocation2 + $0x8] sm:$0xff] }
   0xa   :  { %180 = vmatmul.mubr.msk.bf16.vlgmr.msra.gmra.mxu0 %vm43_vm1, %v190_v3 }
  0xca   :  { %v84_v5 = vpop.f32.mrf.mxu0 }
  0xcb   :  { %v94_v6 = vsel %vm93_vm3, %v84_v5, -inf }
  0xcc   :  { %95 = vmax.xlane.f32.xlu0 %v94_v6  ;;  %v181_v7 = vpop.f32.mrf.mxu0 }
  0xce   :  { %v87_v8 = vpop.f32.mrf.mxu0 }
  0xcf   :  { %v97_v9 = vsel %vm93_vm3, %v87_v8, -inf }
  0xd0   :  { %98 = vmax.xlane.f32.xlu0 %v97_v9  ;;  %v182_v10 = vpop.f32.mrf.mxu0 }
 0x155   :  { %v96_v13 = vpop.xlane.xlu0 %95 }
 0x156   :  { %v100_v14 = vmax.f32 %v91_v12, %v96_v13 }
 0x158   :  { %v102_v16 = vsub.f32 %v91_v12, %v100_v14  ;;  %139 = vst.msk [vmem:[#allocation2] sm:$0xff] %vm19_vm0, %v100_v14  ;;  %114 = vperm.xlu1 %187, %v100_v14  }
 0x159   :  { %v99_v17 = vpop.xlane.xlu0 %98 }
 0x15a   :  { %v101_v18 = vmax.f32 %v92_v15, %v99_v17  ;;  %v104_v30 = vmul.f32 1.442695, %v102_v16 }
 0x15c   :  { %v103_v19 = vsub.f32 %v92_v15, %v101_v18  ;;  %140 = vst.msk [vmem:[#allocation2 + $0x8] sm:$0xff] %vm19_vm0, %v101_v18  ;;  %119 = vperm.xlu1 %187, %v101_v18  }
 0x15e   :  { %v106_v31 = vmul.f32 1.442695, %v103_v19 }
 0x15f   :  { %v144_v33 = vld [vmem:[#allocation2] sm:$0xff] }
 0x160   :  { %v150_v34 = vsub.f32 %v148_v32, %v144_v33 }
 0x162   :  { %v152_v37 = vmul.f32 1.442695, %v150_v34 }
 0x163   :  { %v145_v36 = vld [vmem:[#allocation2 + $0x8] sm:$0xff] }
 0x164   :  { %v151_v38 = vsub.f32 %v149_v35, %v145_v36 }
 0x166   :  { %v154_v41 = vmul.f32 1.442695, %v151_v38 }
 0x1d3   :  { %v115_v20 = vpop.permute.xlu1 %114 }
 0x1d4   :  { %v122_v21 = vsub.f32 %v84_v5, %v115_v20 }
 0x1d6   :  { %v124_v22 = vmul.f32 1.442695, %v122_v21 }
 0x1d7   :  { %v120_v23 = vpop.permute.xlu1 %119 }
 0x1d8   :  { %191 = vpow2.f32 %v124_v22  ;;  %v123_v24 = vsub.f32 %v87_v8, %v120_v23 }
 0x1da   :  { %v126_v25 = vmul.f32 1.442695, %v123_v24 }
 0x1dc   :  { %193 = vpow2.f32 %v126_v25 }
 0x1dd   :  { %195 = vpow2.f32 %v104_v30 }
 0x1de   :  { %197 = vpow2.f32 %v106_v31 }
 0x1df   :  { %199 = vpow2.f32 %v152_v37 }
 0x1e0   :  { %201 = vpow2.f32 %v154_v41 }
 0x1e5   :  { %v192_v26 = vpop.eup %191 }
 0x1e6   :  { %v128_v27 = vsel %vm93_vm3, %v192_v26, 0.0 }
 0x1e7   :  { %129 = vadd.xlane.f32.xlu0 %v128_v27 }
 0x1e9   :  { %v194_v28 = vpop.eup %193 }
 0x1ea   :  { %v131_v29 = vsel %vm93_vm3, %v194_v28, 0.0  ;;  %v196_v39 = vpop.eup %195 }
 0x1eb   :  { %132 = vadd.xlane.f32.xlu1 %v131_v29  ;;  %v110_v42 = vmul.f32 %v196_v39, %v108_v40  ;;  %v198_v43 = vpop.eup %197 }
 0x1ec   :  { %v111_v47 = vmul.f32 %v198_v43, %v109_v45  ;;  %v200_v50 = vpop.eup %199 }
 0x1ed   :  { %v202_v53 = vpop.eup %201 }
 0x270   :  { %v130_v44 = vpop.xlane.xlu0 %129 }
 0x271   :  { %v134_v46 = vadd.f32 %v130_v44, %v110_v42 }
 0x273   :  { %137 = vst.msk [vmem:[#allocation3] sm:$0xff] %vm19_vm0, %v134_v46 }
 0x274   :  { %v133_v48 = vpop.xlane.xlu1 %132 }
 0x275   :  { %v135_v49 = vadd.f32 %v133_v48, %v111_v47 }
 0x277   :  { %138 = vst.msk [vmem:[#allocation3 + $0x8] sm:$0xff] %vm19_vm0, %v135_v49 }
 0x27a   :  { %v146_v51 = vld [vmem:[#allocation3] sm:$0xff] }
 0x27b   :  { %v156_v52 = vsub.f32 %v146_v51, %v200_v50 }
 0x27d   :  { %203 = vlog2.f32 %v156_v52 }
 0x27e   :  { %v147_v54 = vld [vmem:[#allocation3 + $0x8] sm:$0xff] }
 0x27f   :  { %v157_v55 = vsub.f32 %v147_v54, %v202_v53 }
 0x281   :  { %205 = vlog2.f32 %v157_v55 }
 0x28a   :  { %v204_v56 = vpop.eup %203 }
 0x28b   :  { %v159_v57 = vmul.f32 0.6931472, %v204_v56 }
 0x28d   :  { %v162_v58 = vadd.f32 %v159_v57, %v144_v33 }
 0x28e   :  { %v206_v59 = vpop.eup %205 }
 0x28f   :  { %164 = vst.msk [vmem:[%s266_s3] sm:$0xff] %vm19_vm0, %v162_v58  ;;  %v161_v60 = vmul.f32 0.6931472, %v206_v59 }
 0x291   :  { %v163_v61 = vadd.f32 %v161_v60, %v145_v36 }
 0x293   :  { %165 = vst.msk [vmem:[%s266_s3 + $0x8] sm:$0xff] %vm19_vm0, %v163_v61 }

</bundles_post_ra>
